<compile_context>
chip_gen: v7x
topology: tpu7x:2x2x1
jax: 0.10.0
libtpu: 0.0.40
codegen_flags: <defaults>
</compile_context>

<pallas_src>
import jax
import jax.numpy as jnp
from jax.experimental import pallas as pl
from jax.experimental.pallas import tpu as pltpu


NEG_SLOPE = 0.01     # F.leaky_relu default negative_slope
HIDDEN = 64          # logical hidden width of dense1/dense2
HID_PAD = 128        # lane-dense padded hidden width (MXU-friendly)
OUT_PAD = 128        # lane-dense padded action width inside the kernel
TB_CAP = 512         # batch-tile cap (within ~1% of roofline vs 1024, 2x grid steps)
MIN_GRID_STEPS = 8   # target pipeline depth / megacore sharding
VMEM_BUDGET = 10 << 20  # bytes for the batch-dependent, double-buffered working set


def _leaky_relu(x):
    return jnp.where(x > 0, x, NEG_SLOPE * x)


def _round_up(x, m):
    return ((x + m - 1) // m) * m


def mlp_kernel(x_ref, w1_ref, w23_ref, b_ref, o_ref):
    """Fused, lane-dense 3-layer MLP on one (tb, F) batch tile.

    x_ref  : (tb, F)          batch tile of features
    w1_ref : (F, 128)         dense1 weight, zero-padded 64 -> 128 on out dim
    w23_ref: (2, 128, 128)    [dense2, dense3] weights, zero-padded
    b_ref  : (3, 128)         [b1, b2, b3] zero-padded biases
    o_ref  : (tb, n_actions)  narrow output block (only real action columns)
    """
    n_act = o_ref.shape[-1]
    w1 = w1_ref[...]
    w2 = w23_ref[0]
    w3 = w23_ref[1]
    b = b_ref[...]
    b1 = b[0:1, :]
    b2 = b[1:2, :]
    b3 = b[2:3, :n_act]

    def chain(x):
        h1 = _leaky_relu(jnp.dot(x, w1, preferred_element_type=jnp.float32) + b1)
        h2 = _leaky_relu(jnp.dot(h1, w2, preferred_element_type=jnp.float32) + b2)
        y = jnp.dot(h2, w3, preferred_element_type=jnp.float32)
        return (y[:, :n_act] + b3).astype(o_ref.dtype)

    tb = x_ref.shape[0]
    if tb >= 16 and tb % 16 == 0:
        # Two independent half-tile chains -> scheduler fills MXU/VPU bubbles.
        h = tb // 2
        o_ref[:h, :] = chain(x_ref[:h, :])
        o_ref[h:, :] = chain(x_ref[h:, :])
    else:
        o_ref[...] = chain(x_ref[...])


def _pack_params(params):
    """Zero-pad / pack the six Linear params into 3 lane-dense slabs.

    Zero padding is exact: leaky_relu(0) == 0, so padded hidden columns stay
    zero through the whole chain; padded output columns are never stored.
    """
    w1, b1, w2, b2, w3, b3 = params
    dim_features = w1.shape[0]
    n_actions = w3.shape[1]
    assert HIDDEN <= HID_PAD, "hidden width exceeds padded lane width"
    assert n_actions <= OUT_PAD, "n_actions exceeds padded lane width (128)"

    w1p = jnp.zeros((dim_features, HID_PAD), jnp.float32).at[:, :HIDDEN].set(w1)
    w2p = jnp.zeros((HID_PAD, HID_PAD), jnp.float32).at[:HIDDEN, :HIDDEN].set(w2)
    w3p = jnp.zeros((HID_PAD, OUT_PAD), jnp.float32).at[:HIDDEN, :n_actions].set(w3)
    w23p = jnp.stack([w2p, w3p], axis=0)                       # (2, 128, 128)

    bp = jnp.zeros((3, OUT_PAD), jnp.float32)
    bp = bp.at[0, :HIDDEN].set(b1.reshape(-1))
    bp = bp.at[1, :HIDDEN].set(b2.reshape(-1))
    bp = bp.at[2, :n_actions].set(b3.reshape(-1))
    return w1p, w23p, bp, n_actions


def _choose_tb(B, F, n_out):
    """Batch tile: multiple of 8, >= ~MIN_GRID_STEPS grid steps, VMEM-bounded."""
    # per-row bytes: x double-buffer, out double-buffer, f32 intermediates
    per_row = 4 * (2 * F + 2 * n_out + 3 * HID_PAD)
    tb_vmem = max(8, (VMEM_BUDGET // per_row) // 8 * 8)
    tb_steps = _round_up(pl.cdiv(B, MIN_GRID_STEPS), 8)
    tb = min(TB_CAP, tb_vmem, tb_steps, _round_up(B, 8))
    return max(8, tb)


def cnn_w_dense_forward(image, features, params):
    """Forward pass of CNNwDense. `image` is accepted but unused (as in PyTorch)."""
    del image  # not used by the reference forward
    B = features.shape[0]
    F = features.shape[2]
    x = features.reshape(B, F)                      # features.view(B, dim_features)

    w1p, w23p, bp, n_actions = _pack_params(params)

    tb = _choose_tb(B, F, n_actions)
    grid = (pl.cdiv(B, tb),)

    # Explicit VMEM limit: double-buffered x/out tiles + resident weight blocks
    # + live f32 intermediates, with 2x headroom; capped for v7x (64 MiB phys).
    vmem_est = 4 * (
        2 * tb * F
        + 2 * tb * n_actions
        + 2 * F * HID_PAD
        + 2 * 2 * HID_PAD * HID_PAD
        + 2 * 3 * HID_PAD
        + 4 * tb * HID_PAD
    )
    vmem_limit = int(min(48 << 20, max(16 << 20, 2 * vmem_est)))

    out = pl.pallas_call(
        mlp_kernel,
        out_shape=jax.ShapeDtypeStruct((B, n_actions), jnp.float32),
        grid=grid,
        in_specs=[
            pl.BlockSpec((tb, F), lambda i: (i, 0)),                # x tile
            pl.BlockSpec((F, HID_PAD), lambda i: (0, 0)),           # w1 (resident)
            pl.BlockSpec((2, HID_PAD, HID_PAD), lambda i: (0, 0, 0)),  # w2/w3 (resident)
            pl.BlockSpec((3, HID_PAD), lambda i: (0, 0)),           # biases (resident)
        ],
        out_specs=pl.BlockSpec((tb, n_actions), lambda i: (i, 0)),  # narrow output
        compiler_params=pltpu.CompilerParams(
            dimension_semantics=("parallel",),
            vmem_limit_bytes=vmem_limit,
        ),
    )(x, w1p, w23p, bp)

    return out


def init_params(key, dim_features, n_actions):
    """Deterministic init mimicking nn.Linear defaults (uniform ±1/sqrt(fan_in)).
    Weights stored transposed: (in_features, out_features)."""
    ks = jax.random.split(key, 6)

    def lin(kw, kb, fan_in, fan_out):
        bound = 1.0 / jnp.sqrt(jnp.float32(fan_in))
        w = jax.random.uniform(kw, (fan_in, fan_out), jnp.float32, -bound, bound)
        b = jax.random.uniform(kb, (1, fan_out), jnp.float32, -bound, bound)
        return w, b

    w1, b1 = lin(ks[0], ks[1], dim_features, HIDDEN)
    w2, b2 = lin(ks[2], ks[3], HIDDEN, HIDDEN)
    w3, b3 = lin(ks[4], ks[5], HIDDEN, n_actions)
    return (w1, b1, w2, b2, w3, b3)


def reference_forward(image, features, params):
    del image
    w1, b1, w2, b2, w3, b3 = params
    x = features.reshape(features.shape[0], features.shape[2])
    h1 = _leaky_relu(x @ w1 + b1)
    h2 = _leaky_relu(h1 @ w2 + b2)
    return h2 @ w3 + b3


def _check(B, C, H, W, dim_features, n_actions, seed):
    key = jax.random.PRNGKey(seed)
    k_img, k_feat, k_param = jax.random.split(key, 3)

    image = jax.random.normal(k_img, (B, C, H, W), jnp.float32)
    features = jax.random.normal(k_feat, (B, 1, dim_features), jnp.float32)
    params = init_params(k_param, dim_features, n_actions)

    out = cnn_w_dense_forward(image, features, params)
    out = jax.block_until_ready(out)

    ref = reference_forward(image, features, params)
    assert out.shape == (B, n_actions), f"bad shape {out.shape}"
    assert jnp.allclose(out, ref, atol=1e-5, rtol=1e-5), "mismatch vs JAX reference"


if __name__ == "__main__":
    # Shapes consistent with the module's forward:
    #   image    : (B, C, H, W)  NCHW, unused
    #   features : (B, 1, dim_features)
    # Case 1: tiny demo batch (single grid step, non-interleaved path).
    _check(B=8, C=4, H=16, W=16, dim_features=32, n_actions=4, seed=0)
    # Case 2: ragged batch / narrow odd action count (multi-step grid,
    # ragged last block, interleaved half-tile path).
    _check(B=200, C=4, H=16, W=16, dim_features=48, n_actions=6, seed=0)

    print("KERNEL_OK")
</pallas_src>

<mosaic_0001>
module attributes {stable_mosaic.version = 11 : i64} {
  func.func @mlp_kernel(%arg0: i32, %arg1: memref<8x32xf32, #tpu.memory_space<vmem>>, %arg2: memref<32x128xf32, #tpu.memory_space<vmem>>, %arg3: memref<2x128x128xf32, #tpu.memory_space<vmem>>, %arg4: memref<3x128xf32, #tpu.memory_space<vmem>>, %arg5: memref<8x4xf32, #tpu.memory_space<vmem>>) attributes {dimension_semantics = [#tpu.dimension_semantics<parallel>], iteration_bounds = array<i64: 1>, scalar_prefetch = 0 : i64, scratch_operands = 0 : i64, tpu.core_type = #tpu.core_type<tc>, window_params = [{transform_indices = @transform_0, window_bounds = array<i64: 8, 32>}, {pipeline_mode = #tpu.pipeline_mode<synchronous>, transform_indices = @transform_1, window_bounds = array<i64: 32, 128>}, {pipeline_mode = #tpu.pipeline_mode<synchronous>, transform_indices = @transform_2, window_bounds = array<i64: 2, 128, 128>}, {pipeline_mode = #tpu.pipeline_mode<synchronous>, transform_indices = @transform_3, window_bounds = array<i64: 3, 128>}, {transform_indices = @transform_4, window_bounds = array<i64: 8, 4>}]} {
    %c0 = arith.constant 0 : index
    %c0_0 = arith.constant 0 : index
    %0 = vector.load %arg2[%c0, %c0_0] : memref<32x128xf32, #tpu.memory_space<vmem>>, vector<32x128xf32>
    %c0_1 = arith.constant 0 : index
    %c0_2 = arith.constant 0 : index
    %c0_3 = arith.constant 0 : index
    %1 = vector.load %arg3[%c0_1, %c0_2, %c0_3] : memref<2x128x128xf32, #tpu.memory_space<vmem>>, vector<1x128x128xf32>
    %2 = vector.shape_cast %1 : vector<1x128x128xf32> to vector<128x128xf32>
    %c1 = arith.constant 1 : index
    %c0_4 = arith.constant 0 : index
    %c0_5 = arith.constant 0 : index
    %3 = vector.load %arg3[%c1, %c0_4, %c0_5] : memref<2x128x128xf32, #tpu.memory_space<vmem>>, vector<1x128x128xf32>
    %4 = vector.shape_cast %3 : vector<1x128x128xf32> to vector<128x128xf32>
    %c0_6 = arith.constant 0 : index
    %c0_7 = arith.constant 0 : index
    %5 = vector.load %arg4[%c0_6, %c0_7] : memref<3x128xf32, #tpu.memory_space<vmem>>, vector<3x128xf32>
    %6 = vector.extract_strided_slice %5 {offsets = [0, 0], sizes = [1, 128], strides = [1, 1]} : vector<3x128xf32> to vector<1x128xf32>
    %7 = vector.extract_strided_slice %5 {offsets = [1, 0], sizes = [1, 128], strides = [1, 1]} : vector<3x128xf32> to vector<1x128xf32>
    %8 = vector.extract_strided_slice %5 {offsets = [2, 0], sizes = [1, 4], strides = [1, 1]} : vector<3x128xf32> to vector<1x4xf32>
    %c0_8 = arith.constant 0 : index
    %c0_9 = arith.constant 0 : index
    %9 = vector.load %arg1[%c0_8, %c0_9] : memref<8x32xf32, #tpu.memory_space<vmem>>, vector<8x32xf32>
    %cst = arith.constant dense<0.000000e+00> : vector<8x128xf32>
    %10 = tpu.matmul %9, %0, %cst {dimension_numbers = #tpu.dot_dimension_numbers<[1], [0], [0], [1], [0, 0, 1, 1], [], []>} : vector<8x32xf32>, vector<32x128xf32>, vector<8x128xf32> -> vector<8x128xf32>
    %11 = vector.broadcast %6 : vector<1x128xf32> to vector<8x128xf32>
    %12 = arith.addf %10, %11 : vector<8x128xf32>
    %cst_10 = arith.constant 0.000000e+00 : f32
    %13 = vector.broadcast %cst_10 : f32 to vector<8x128xf32>
    %14 = arith.cmpf ogt, %12, %13 : vector<8x128xf32>
    %cst_11 = arith.constant 0.00999999977 : f32
    %15 = vector.broadcast %cst_11 : f32 to vector<8x128xf32>
    %16 = arith.mulf %15, %12 : vector<8x128xf32>
    %17 = arith.select %14, %12, %16 : vector<8x128xi1>, vector<8x128xf32>
    %cst_12 = arith.constant dense<0.000000e+00> : vector<8x128xf32>
    %18 = tpu.matmul %17, %2, %cst_12 {dimension_numbers = #tpu.dot_dimension_numbers<[1], [0], [0], [1], [0, 0, 1, 1], [], []>} : vector<8x128xf32>, vector<128x128xf32>, vector<8x128xf32> -> vector<8x128xf32>
    %19 = vector.broadcast %7 : vector<1x128xf32> to vector<8x128xf32>
    %20 = arith.addf %18, %19 : vector<8x128xf32>
    %cst_13 = arith.constant 0.000000e+00 : f32
    %21 = vector.broadcast %cst_13 : f32 to vector<8x128xf32>
    %22 = arith.cmpf ogt, %20, %21 : vector<8x128xf32>
    %cst_14 = arith.constant 0.00999999977 : f32
    %23 = vector.broadcast %cst_14 : f32 to vector<8x128xf32>
    %24 = arith.mulf %23, %20 : vector<8x128xf32>
    %25 = arith.select %22, %20, %24 : vector<8x128xi1>, vector<8x128xf32>
    %cst_15 = arith.constant dense<0.000000e+00> : vector<8x128xf32>
    %26 = tpu.matmul %25, %4, %cst_15 {dimension_numbers = #tpu.dot_dimension_numbers<[1], [0], [0], [1], [0, 0, 1, 1], [], []>} : vector<8x128xf32>, vector<128x128xf32>, vector<8x128xf32> -> vector<8x128xf32>
    %27 = vector.extract_strided_slice %26 {offsets = [0, 0], sizes = [8, 4], strides = [1, 1]} : vector<8x128xf32> to vector<8x4xf32>
    %28 = vector.broadcast %8 : vector<1x4xf32> to vector<8x4xf32>
    %29 = arith.addf %27, %28 : vector<8x4xf32>
    %c0_16 = arith.constant 0 : index
    %c0_17 = arith.constant 0 : index
    %30 = vector.load %arg5[%c0_16, %c0_17] : memref<8x4xf32, #tpu.memory_space<vmem>>, vector<8x4xf32>
    tpu.vector_store %arg5[%c0_16, %c0_17], %29 {strides = array<i32>} : memref<8x4xf32, #tpu.memory_space<vmem>>, vector<8x4xf32>,
    return
  }
  func.func @transform_0(%arg0: i32) -> (i32, i32) {
    %c0_i32 = arith.constant 0 : i32
    %c0_i32_0 = arith.constant 0 : i32
    return %arg0, %c0_i32 : i32, i32
  }
  func.func @transform_1(%arg0: i32) -> (i32, i32) {
    %c0_i32 = arith.constant 0 : i32
    %c0_i32_0 = arith.constant 0 : i32
    %c0_i32_1 = arith.constant 0 : i32
    return %c0_i32, %c0_i32_0 : i32, i32
  }
  func.func @transform_2(%arg0: i32) -> (i32, i32, i32) {
    %c0_i32 = arith.constant 0 : i32
    %c0_i32_0 = arith.constant 0 : i32
    %c0_i32_1 = arith.constant 0 : i32
    %c0_i32_2 = arith.constant 0 : i32
    return %c0_i32, %c0_i32_0, %c0_i32_1 : i32, i32, i32
  }
  func.func @transform_3(%arg0: i32) -> (i32, i32) {
    %c0_i32 = arith.constant 0 : i32
    %c0_i32_0 = arith.constant 0 : i32
    %c0_i32_1 = arith.constant 0 : i32
    return %c0_i32, %c0_i32_0 : i32, i32
  }
  func.func @transform_4(%arg0: i32) -> (i32, i32) {
    %c0_i32 = arith.constant 0 : i32
    %c0_i32_0 = arith.constant 0 : i32
    return %arg0, %c0_i32 : i32, i32
  }
}

</mosaic_0001>

<bundles_post_ra>
// kernel: tpu_custom_call.1
= control target key start
LH: loop header
LB: loop body
LE: loop exit
PB: predicated region body
PF: predicated region fallthrough
CT: control target
= control target key end

     0   :  { %9 = vsyncpa [#allocation3], 0  ;;  %s691_s0 = inlined_call_operand.hbm [shape: f32[8,32], index: 0, kind: input, shape index: {}]   ;;  %s692_s1 = inlined_call_operand.hbm [shape: f32[32,128], index: 1, kind: input, shape index: {}]   ;;  %s693_s2 = inlined_call_operand.hbm [shape: f32[2,128,128], index: 2, kind: input, shape index: {}]   ;;  %s694_s3 = inlined_call_operand.vmem [shape: f32[3,128], index: 3, kind: input, shape index: {}]   ;;  %s695_s4 = inlined_call_operand.vmem [shape: f32[8,4], index: 4, kind: output, shape index: {}]  }
   0x1   :  { %10 = vsyncpa [#allocation5], 0  ;;  %s589_s15 = smov [#allocation4]   ;;  %s519_s19 = scalar_lea.hbm %s692_s1, 512 }
   0x2   :  { %s26_s16 = sshll.u32 %s589_s15, 4  ;;  %p520_p0 = scmp.ne.s32.totalorder %s692_s1, %s519_s19  ;;  %s27_s16 = int_to_ptr.vmem [resolvable:$true] %s26_s16 }
   0x3   :  { %p523_p1 = scmp.lt.u32.totalorder %s519_s19, %s692_s1 }
   0x5   :  { %p525_p2 = pnand %p523_p1, %p520_p0 }
   0x7   :  { %528 = shalt.err (!%p525_p2)
}
   0x8   :  { %s529_s24 = scalar_lea.vmem %s27_s16, 512  ;;  %p534_p4 = scmp.lt.s32.totalorder %s27_s16, %s27_s16 }
   0x9   :  { %p530_p3 = scmp.ne.s32.totalorder %s27_s16, %s529_s24  ;;  %p535_p5 = scmp.lt.s32.totalorder %s529_s24, %s529_s24 }
   0xb   :  { %p536_p6 = por %p535_p5, %p534_p4 }
   0xd   :  { %p537_p7 = pnand %p536_p6, %p530_p3 }
   0xf   :  { %540 = shalt.err (!%p537_p7)
}
  0x10   :  { %s590_s25 = smov 128   ;;  %s591_s26 = smov 8  }
  0x11   :  { %32 = dma.hbm_to_vmem [thread:$0]  %s692_s1, 512, %s27_s16, [#allocation5], %s590_s25, %s590_s25, %s591_s26  }
  0x12   :  { %s592_s29 = smov [#allocation2]   ;;  %s593_s5 = smov [#allocation6]  }
  0x13   :  { %s17_s30 = sshll.u32 %s592_s29, 4  ;;  %s38_s6 = sshll.u32 %s593_s5, 4  ;;  %s18_s30 = int_to_ptr.vmem [resolvable:$true] %s17_s30  ;;  %s39_s6 = int_to_ptr.vmem [resolvable:$true] %s38_s6 }
  0x14   :  { %s541_s9 = scalar_lea.hbm %s691_s0, 128 }
  0x15   :  { %p542_p8 = scmp.ne.s32.totalorder %s691_s0, %s541_s9  ;;  %p545_p9 = scmp.lt.u32.totalorder %s541_s9, %s691_s0 }
  0x17   :  { %p547_p10 = pnand %p545_p9, %p542_p8 }
  0x19   :  { %550 = shalt.err (!%p547_p10)
}
  0x1a   :  { %s551_s1 = scalar_lea.vmem %s18_s30, 128  ;;  %p556_p12 = scmp.lt.s32.totalorder %s18_s30, %s18_s30 }
  0x1b   :  { %p552_p11 = scmp.ne.s32.totalorder %s18_s30, %s551_s1  ;;  %p557_p13 = scmp.lt.s32.totalorder %s551_s1, %s551_s1 }
  0x1d   :  { %p558_p0 = por %p557_p13, %p556_p12 }
  0x1f   :  { %p559_p1 = pnand %p558_p0, %p552_p11 }
  0x21   :  { %562 = shalt.err (!%p559_p1)
}
  0x22   :  { %20 = dma.hbm_to_vmem [thread:$0]  %s691_s0, 128, %s18_s30, [#allocation3]  }
  0x23   :  { %s563_s18 = scalar_lea.hbm %s693_s2, 4096 }
  0x24   :  { %p564_p2 = scmp.ne.s32.totalorder %s693_s2, %s563_s18  ;;  %p567_p3 = scmp.lt.u32.totalorder %s563_s18, %s693_s2 }
  0x26   :  { %p569_p4 = pnand %p567_p3, %p564_p2 }
  0x28   :  { %572 = shalt.err (!%p569_p4)
}
  0x29   :  { %s573_s23 = scalar_lea.vmem %s39_s6, 4096  ;;  %p578_p6 = scmp.lt.s32.totalorder %s39_s6, %s39_s6 }
  0x2a   :  { %p574_p5 = scmp.ne.s32.totalorder %s39_s6, %s573_s23  ;;  %p579_p7 = scmp.lt.s32.totalorder %s573_s23, %s573_s23 }
  0x2c   :  { %p580_p8 = por %p579_p7, %p578_p6 }
  0x2e   :  { %p581_p9 = pnand %p580_p8, %p574_p5 }
  0x30   :  { %584 = shalt.err (!%p581_p9)
}
  0x31   :  { %44 = dma.hbm_to_vmem [thread:$0]  %s693_s2, 4096, %s39_s6, [#allocation5], %s590_s25, %s590_s25, %s591_s26  }
  0x32   :  { %585 = dma.done.wait [#allocation3], 128  }
  0x33   :  { %586 = vsyncadd [#allocation3], 4294967168 }
  0x34   :  { %587 = dma.done.wait [#allocation5], 4608  }
  0x35   :  { %588 = vsyncadd [#allocation5], 4294962688  ;;  %v594_v0 = vmov 0.0|0.0   ;;  %vm595_vm0 = vmmov 0   ;;  %v596_v1 = vmov 0.0   ;;  %v56_v2 = vld [vmem:[#allocation4] sm:$0xff]  ;;  %v95_v54 = vlaneseq }
  0x36   :  { %457 = vmatprep.subr.bf16.mxu0 %v594_v0  ;;  %384 = vmatprep.mubr.msk.f32.mxu0 %vm595_vm0, %v596_v1  ;;  %v57_v3 = vld [vmem:[#allocation4 + $0x8] sm:$0xff]  ;;  %v58_v4 = vld [vmem:[#allocation4 + $0x10] sm:$0xff]  ;;  %v59_v6 = vld [vmem:[#allocation4 + $0x18] sm:$0xff]  ;;  %vm99_vm1 = vcmask 261120   ;;  %vm328_vm4 = vcmask 31744  }
  0x37   :  { %463 = vmatprep.subr.bf16.mxu1 %v594_v0  ;;  %419 = vmatprep.mubr.msk.f32.mxu1 %vm595_vm0, %v596_v1  ;;  %v458_v5 = vpack.c.bf16 %v57_v3, %v56_v2  ;;  %v60_v7 = vld [vmem:[#allocation6] sm:$0xff]  ;;  %v61_v8 = vld [vmem:[#allocation6 + $0x8] sm:$0xff]  ;;  %v62_v9 = vld [vmem:[#allocation6 + $0x10] sm:$0xff]  ;;  %v461_v11 = vpack.c.bf16 %v59_v6, %v58_v4  ;;  %v96_v55 = vshrl.u32 %v95_v54, 7 }
  0x38   :  { %v63_v10 = vld [vmem:[#allocation6 + $0x18] sm:$0xff]  ;;  %v464_v12 = vpack.c.bf16 %v61_v8, %v60_v7  ;;  %v64_v14 = vld [vmem:[#allocation6 + $0x20] sm:$0xff]  ;;  %v65_v15 = vld [vmem:[#allocation6 + $0x28] sm:$0xff] }
  0x39   :  { %459 = vmatpush3.bf16.msra.mxu0 %v458_v5  ;;  %v467_v13 = vpack.c.bf16 %v63_v10, %v62_v9  ;;  %v94_v16 = vld [vmem:[#allocation2] sm:$0xff]  ;;  %v470_v17 = vpack.c.bf16 %v65_v15, %v64_v14  ;;  %v66_v18 = vld [vmem:[#allocation6 + $0x30] sm:$0xff]  ;;  %v68_v21 = vld [vmem:[#allocation6 + $0x40] sm:$0xff]  ;;  %v97_v56 = vsub.s32 0, %v96_v55  ;;  %v325_v10 = vsub.s32 2, %v96_v55 }
  0x3a   :  { %460 = vmatprep.subr.bf16.mxu0 %v594_v0  ;;  %465 = vmatpush3.bf16.msra.mxu1 %v464_v12  ;;  %v67_v19 = vld [vmem:[#allocation6 + $0x38] sm:$0xff]  ;;  %v69_v22 = vld [vmem:[#allocation6 + $0x48] sm:$0xff]  ;;  %v70_v24 = vld [vmem:[#allocation6 + $0x50] sm:$0xff] }
  0x3b   :  { %466 = vmatprep.subr.bf16.mxu1 %v594_v0  ;;  %v473_v20 = vpack.c.bf16 %v67_v19, %v66_v18  ;;  %v476_v23 = vpack.c.bf16 %v69_v22, %v68_v21  ;;  %v71_v25 = vld [vmem:[#allocation6 + $0x58] sm:$0xff]  ;;  %v72_v27 = vld [vmem:[#allocation6 + $0x60] sm:$0xff]  ;;  %v73_v28 = vld [vmem:[#allocation6 + $0x68] sm:$0xff] }
  0x3c   :  { %v479_v26 = vpack.c.bf16 %v71_v25, %v70_v24  ;;  %v482_v29 = vpack.c.bf16 %v73_v28, %v72_v27  ;;  %v74_v30 = vld [vmem:[#allocation6 + $0x70] sm:$0xff]  ;;  %v75_v31 = vld [vmem:[#allocation6 + $0x78] sm:$0xff]  ;;  %v77_v33 = vld [vmem:[#allocation6 + $0x80] sm:$0xff] }
  0x3d   :  { %462 = vmatpush3.bf16.msra.mxu0 %v461_v11  ;;  %v485_v32 = vpack.c.bf16 %v75_v31, %v74_v30  ;;  %v78_v34 = vld [vmem:[#allocation6 + $0x88] sm:$0xff]  ;;  %v79_v35 = vld [vmem:[#allocation6 + $0x90] sm:$0xff]  ;;  %v80_v37 = vld [vmem:[#allocation6 + $0x98] sm:$0xff] }
  0x3e   :  { %487 = vmatprep.subr.bf16.mxu0 %v594_v0  ;;  %468 = vmatpush3.bf16.msra.mxu1 %v467_v13  ;;  %v488_v36 = vpack.c.bf16 %v78_v34, %v77_v33  ;;  %v491_v38 = vpack.c.bf16 %v80_v37, %v79_v35  ;;  %v81_v39 = vld [vmem:[#allocation6 + $0xa0] sm:$0xff]  ;;  %v82_v40 = vld [vmem:[#allocation6 + $0xa8] sm:$0xff]  ;;  %v83_v42 = vld [vmem:[#allocation6 + $0xb0] sm:$0xff] }
  0x3f   :  { %469 = vmatprep.subr.bf16.mxu1 %v594_v0  ;;  %v494_v41 = vpack.c.bf16 %v82_v40, %v81_v39  ;;  %v84_v43 = vld [vmem:[#allocation6 + $0xb8] sm:$0xff]  ;;  %v85_v45 = vld [vmem:[#allocation6 + $0xc0] sm:$0xff]  ;;  %v86_v46 = vld [vmem:[#allocation6 + $0xc8] sm:$0xff] }
  0x40   :  { %385 = vmatmul.mubr.msk.f32.vlgmr.msra.gmra.mrb[0].mxu0 %vm99_vm1, %v94_v16  ;;  %v497_v44 = vpack.c.bf16 %v84_v43, %v83_v42  ;;  %v500_v47 = vpack.c.bf16 %v86_v46, %v85_v45  ;;  %v87_v48 = vld [vmem:[#allocation6 + $0xd0] sm:$0xff]  ;;  %v88_v49 = vld [vmem:[#allocation6 + $0xd8] sm:$0xff]  ;;  %v89_v51 = vld [vmem:[#allocation6 + $0xe0] sm:$0xff] }
  0x41   :  { %454 = vmatprep.mubr.msk.f32.mxu0 %vm595_vm0, %v596_v1  ;;  %489 = vmatpush3.bf16.msra.mxu0 %v488_v36  ;;  %v503_v50 = vpack.c.bf16 %v88_v49, %v87_v48  ;;  %v90_v52 = vld [vmem:[#allocation6 + $0xe8] sm:$0xff]  ;;  %v93_v57 = vld [vmem:[%s694_s3] sm:$0x7]  ;;  %v92_v2 = vld [vmem:[#allocation6 + $0xf8] sm:$0xff] }
  0x42   :  { %471 = vmatpush3.bf16.msra.mxu1 %v470_v17  ;;  %490 = vmatprep.subr.bf16.mxu0 %v594_v0  ;;  %v506_v53 = vpack.c.bf16 %v90_v52, %v89_v51  ;;  %v98_v58 = vrot.slane %v93_v57, %v97_v56  ;;  %v91_v1 = vld [vmem:[#allocation6 + $0xf0] sm:$0xff]  ;;  %v326_v11 = vrot.slane %v93_v57, %v325_v10 }
  0x43   :  { %472 = vmatprep.subr.bf16.mxu1 %v594_v0  ;;  %v509_v3 = vpack.c.bf16 %v92_v2, %v91_v1 }
  0x45   :  { %492 = vmatpush3.bf16.msra.mxu0 %v491_v38 }
  0x46   :  { %474 = vmatpush3.bf16.msra.mxu1 %v473_v20  ;;  %493 = vmatprep.subr.bf16.mxu0 %v594_v0 }
  0x47   :  { %475 = vmatprep.subr.bf16.mxu1 %v594_v0 }
  0x49   :  { %495 = vmatpush3.bf16.msra.mxu0 %v494_v41 }
  0x4a   :  { %477 = vmatpush3.bf16.msra.mxu1 %v476_v23  ;;  %496 = vmatprep.subr.bf16.mxu0 %v594_v0 }
  0x4b   :  { %478 = vmatprep.subr.bf16.mxu1 %v594_v0 }
  0x4d   :  { %498 = vmatpush3.bf16.msra.mxu0 %v497_v44 }
  0x4e   :  { %480 = vmatpush3.bf16.msra.mxu1 %v479_v26  ;;  %499 = vmatprep.subr.bf16.mxu0 %v594_v0 }
  0x4f   :  { %481 = vmatprep.subr.bf16.mxu1 %v594_v0 }
  0x51   :  { %501 = vmatpush3.bf16.msra.mxu0 %v500_v47 }
  0x52   :  { %483 = vmatpush3.bf16.msra.mxu1 %v482_v29  ;;  %502 = vmatprep.subr.bf16.mxu0 %v594_v0 }
  0x53   :  { %484 = vmatprep.subr.bf16.mxu1 %v594_v0 }
  0x55   :  { %504 = vmatpush3.bf16.msra.mxu0 %v503_v50 }
  0x56   :  { %486 = vmatpush3.bf16.msra.mxu1 %v485_v32  ;;  %505 = vmatprep.subr.bf16.mxu0 %v594_v0 }
  0x59   :  { %507 = vmatpush3.bf16.msra.mxu0 %v506_v53 }
  0x5a   :  { %508 = vmatprep.subr.bf16.mxu0 %v594_v0  ;;  %v178_v0 = vsub.s32 1, %v96_v55 }
  0x5c   :  { %v179_v4 = vrot.slane %v93_v57, %v178_v0 }
  0x5d   :  { %510 = vmatpush3.bf16.msra.mxu0 %v509_v3 }
 0x113   :  { %v169_v59 = vpop.f32.mrb[0].mxu0 }
 0x114   :  { %v170_v60 = vadd.f32 %v169_v59, %v98_v58  ;;  %v386_v61 = vpop.f32.mrb[1].mxu0 }
 0x116   :  { %v174_v62 = vmul.f32 0.01, %v170_v60  ;;  %vm173_vm2 = vcmp.gt.f32.partialorder %v170_v60, 0.0 }
 0x118   :  { %v175_v63 = vsel %vm173_vm2, %v170_v60, %v174_v62 }
 0x119   :  { %420 = vmatmul.mubr.f32.vlgmr.msra.gmra.mrb[0].mxu1 %v175_v63 }
 0x1ec   :  { %v246_v5 = vpop.f32.mrb[0].mxu1 }
 0x1ed   :  { %v247_v6 = vadd.f32 %v246_v5, %v179_v4  ;;  %v421_v7 = vpop.f32.mrb[1].mxu1 }
 0x1ef   :  { %vm250_vm3 = vcmp.gt.f32.partialorder %v247_v6, 0.0  ;;  %v251_v8 = vmul.f32 0.01, %v247_v6 }
 0x1f1   :  { %v252_v9 = vsel %vm250_vm3, %v247_v6, %v251_v8 }
 0x1f2   :  { %455 = vmatmul.mubr.f32.vlgmr.msra.gmra.mrb[2].mxu0 %v252_v9 }
 0x2c5   :  { %v319_v12 = vpop.f32.mrb[2].mxu0 }
 0x2c6   :  { %v327_v13 = vadd.f32 %v326_v11, %v319_v12  ;;  %v456_v14 = vpop.f32.mrb[3].mxu0 }
 0x2c8   :  { %329 = vst.msk [vmem:[%s695_s4] sm:$0xff] %vm328_vm4, %v327_v13 }
 0x2c9   :  { %334 = vsyncpa [#allocation3], 1 }
 0x2ca   :  { %335 = vsyncpa [#allocation5], 1 }

</bundles_post_ra>
